<compile_context>
chip_gen: v7x
topology: tpu7x:2x2x1
jax: 0.10.0
libtpu: 0.0.40
codegen_flags: <defaults>
</compile_context>

<pallas_src>
import math

import jax
import jax.numpy as jnp
from jax.experimental import pallas as pl
from jax.experimental.pallas import tpu as pltpu


# ---------------------------------------------------------------------------
# Kernels
# ---------------------------------------------------------------------------

def _ffn_resident_kernel(x_ref, w1_ref, b1_ref, w2_ref, b2_ref, o_ref):
    """Plan A: weights fully VMEM-resident; grid iterates over row tiles only.

    x_ref (tile_m, E)  w1_ref (E, H)  b1_ref (1, H)
    w2_ref (H, E)      b2_ref (1, E)  o_ref (tile_m, E)
    W1/W2/b1/b2 index_maps are constant -> DMA'd once, resident for all tiles.
    """
    h = jnp.dot(x_ref[...], w1_ref[...], preferred_element_type=jnp.float32)
    h = jnp.maximum(h + b1_ref[...].astype(jnp.float32), 0.0)
    y = jnp.dot(h.astype(w2_ref.dtype), w2_ref[...],
                preferred_element_type=jnp.float32)
    # Dropout == identity (inference semantics).
    o_ref[...] = (y + b2_ref[...].astype(jnp.float32)).astype(o_ref.dtype)


def _ffn_streamed_kernel(x_ref, w1_ref, b1_ref, w2_ref, b2_ref, o_ref, acc_ref):
    """Plan B: hidden dim H streamed in tiles (innermost 'arbitrary' axis).

    x_ref (tile_m, E)  w1_ref (E, tile_h)  b1_ref (1, tile_h)
    w2_ref (tile_h, E) b2_ref (1, E)       o_ref (tile_m, E)
    acc_ref (tile_m, E) f32 scratch, persists across the hidden-dim loop.
    """
    k = pl.program_id(1)

    h = jnp.dot(x_ref[...], w1_ref[...], preferred_element_type=jnp.float32)
    h = jnp.maximum(h + b1_ref[...].astype(jnp.float32), 0.0)
    partial = jnp.dot(h.astype(w2_ref.dtype), w2_ref[...],
                      preferred_element_type=jnp.float32)

    # First slice stores directly: no zero-init + read-modify-write.
    @pl.when(k == 0)
    def _first():
        acc_ref[...] = partial

    @pl.when(k != 0)
    def _accum():
        acc_ref[...] += partial

    @pl.when(k == pl.num_programs(1) - 1)
    def _finalize():
        # Dropout == identity (inference semantics).
        o_ref[...] = (acc_ref[...]
                      + b2_ref[...].astype(jnp.float32)).astype(o_ref.dtype)


# ---------------------------------------------------------------------------
# Tiling / VMEM-budget helpers
# ---------------------------------------------------------------------------

def _round_up(x, m):
    return ((x + m - 1) // m) * m


def _physical_vmem_bytes():
    """Per-core VMEM capacity; conservative fallback when the query fails."""
    try:
        info = pltpu.get_tpu_info()
        cap = int(getattr(info, "vmem_capacity_bytes", 0) or 0)
        if cap > 0:
            return cap
    except Exception:
        pass
    return 64 << 20  # v7x per-TensorCore (smallest of v5e/v6e/v7x)


def _pick_row_tile(M, *, target=512, align=16):
    """Row tile: multiple of `align`, <= target; small M is split into two
    tiles when possible so the 'parallel' axis shards across v7x's 2 TCs."""
    target = max(align, (target // align) * align)
    Mr = _round_up(M, align)
    if Mr > target:
        return target
    half = _round_up((Mr + 1) // 2, align)
    return half if half < Mr else Mr


def _pick_hidden_tile(H, *, target=512, align=128):
    """Largest multiple of `align` dividing H and <= target (falls back to the
    full H extent when no aligned divisor exists, e.g. toy shapes)."""
    if H <= target:
        return H
    t = (target // align) * align
    while t >= align:
        if H % t == 0:
            return t
        t -= align
    return H


def _resident_vmem_bytes(tile_m, E, H, csize, osize):
    weights = 2 * (E * H + H * E + H + E) * csize        # double-buffered specs
    streams = 2 * tile_m * E * (csize + osize)           # x in / out, double-buffered
    interm = tile_m * H * (4 + csize) + tile_m * E * 4   # h (f32 + bf16 cast), y
    return weights + streams + interm


def _streamed_vmem_bytes(tile_m, tile_h, E, csize, osize):
    weights = 2 * (E * tile_h + tile_h * E + tile_h + E) * csize
    streams = 2 * tile_m * E * (csize + osize)
    acc = tile_m * E * 4
    interm = tile_m * tile_h * (4 + csize) + tile_m * E * 4
    return weights + streams + acc + interm


# ---------------------------------------------------------------------------
# Public entry point
# ---------------------------------------------------------------------------

def feed_forward(x, w1, b1, w2, b2, *, tile_m=None, tile_h=None,
                 compute_dtype=jnp.bfloat16, vmem_budget_bytes=None):
    """y = relu(x @ W1 + b1) @ W2 + b2  (Dropout == identity).

    x: (B, S, E).  Weights stored (in_features, out_features); biases may be
    1-D (H,)/(E,) or 2-D (1, H)/(1, E).  Output keeps x.dtype; compute runs in
    `compute_dtype` (bf16 MXU fast path) with f32 accumulation.
    """
    B, S, E = x.shape
    E_in, H = w1.shape
    assert E_in == E and w2.shape == (H, E)
    b1 = jnp.reshape(b1, (1, H))
    b2 = jnp.reshape(b2, (1, E))

    out_dtype = x.dtype
    # Make the bf16 MXU fast path contractual: cast inputs/weights explicitly.
    xc = x.reshape(B * S, E).astype(compute_dtype)
    w1c, b1c = w1.astype(compute_dtype), b1.astype(compute_dtype)
    w2c, b2c = w2.astype(compute_dtype), b2.astype(compute_dtype)
    csize = jnp.dtype(compute_dtype).itemsize
    osize = jnp.dtype(out_dtype).itemsize

    M = B * S
    if vmem_budget_bytes is None:
        vmem_budget_bytes = int(_physical_vmem_bytes() * 0.85)

    # Row tile: big enough to amortize weight traffic when streaming, multiple
    # of 16 (bf16 sublane packing), split on small M for 2-TC sharding.
    if tile_m is None:
        tile_m = _pick_row_tile(M, target=512)
    else:
        tile_m = max(16, _round_up(tile_m, 16))

    # Plan A (resident weights) vs Plan B (H streamed into an f32 accumulator).
    use_resident = (tile_h is None and
                    _resident_vmem_bytes(tile_m, E, H, csize, osize)
                    <= vmem_budget_bytes)

    if not use_resident:
        if tile_h is None:
            tile_h = _pick_hidden_tile(H, target=512)
        assert H % tile_h == 0, "hidden dim must be divisible by tile_h"
        # Shrink tiles until the streamed working set fits the VMEM budget.
        while (_streamed_vmem_bytes(tile_m, tile_h, E, csize, osize)
               > vmem_budget_bytes):
            if tile_h > 128 and H % (tile_h // 2) == 0:
                tile_h //= 2
            elif tile_m > 64:
                tile_m = max(16, _round_up(tile_m // 2, 16))
            else:
                break  # best effort; compiler will report if it truly can't fit

    # Pad rows so M is a whole number of row tiles (ragged B*S supported).
    M_pad = _round_up(max(M, tile_m), tile_m)
    if M_pad != M:
        xc = jnp.pad(xc, ((0, M_pad - M), (0, 0)))
    num_row_tiles = M_pad // tile_m

    if use_resident:
        need = _resident_vmem_bytes(tile_m, E, H, csize, osize)
        vmem_limit = int(min(vmem_budget_bytes,
                             max(need * 5 // 4 + (2 << 20), 32 << 20)))
        out2 = pl.pallas_call(
            _ffn_resident_kernel,
            out_shape=jax.ShapeDtypeStruct((M_pad, E), out_dtype),
            grid_spec=pltpu.PrefetchScalarGridSpec(
                num_scalar_prefetch=0,
                grid=(num_row_tiles,),
                in_specs=[
                    pl.BlockSpec((tile_m, E), lambda i: (i, 0)),   # x rows
                    pl.BlockSpec((E, H), lambda i: (0, 0)),        # W1 (resident)
                    pl.BlockSpec((1, H), lambda i: (0, 0)),        # b1 (resident)
                    pl.BlockSpec((H, E), lambda i: (0, 0)),        # W2 (resident)
                    pl.BlockSpec((1, E), lambda i: (0, 0)),        # b2 (resident)
                ],
                out_specs=pl.BlockSpec((tile_m, E), lambda i: (i, 0)),
            ),
            compiler_params=pltpu.CompilerParams(
                dimension_semantics=("parallel",),
                vmem_limit_bytes=vmem_limit,
            ),
        )(xc, w1c, b1c, w2c, b2c)
    else:
        need = _streamed_vmem_bytes(tile_m, tile_h, E, csize, osize)
        vmem_limit = int(min(vmem_budget_bytes,
                             max(need * 5 // 4 + (2 << 20), 32 << 20)))
        out2 = pl.pallas_call(
            _ffn_streamed_kernel,
            out_shape=jax.ShapeDtypeStruct((M_pad, E), out_dtype),
            grid_spec=pltpu.PrefetchScalarGridSpec(
                num_scalar_prefetch=0,
                grid=(num_row_tiles, H // tile_h),
                in_specs=[
                    pl.BlockSpec((tile_m, E), lambda i, k: (i, 0)),   # x rows
                    pl.BlockSpec((E, tile_h), lambda i, k: (0, k)),   # W1 slice
                    pl.BlockSpec((1, tile_h), lambda i, k: (0, k)),   # b1 slice
                    pl.BlockSpec((tile_h, E), lambda i, k: (k, 0)),   # W2 slice
                    pl.BlockSpec((1, E), lambda i, k: (0, 0)),        # b2
                ],
                out_specs=pl.BlockSpec((tile_m, E), lambda i, k: (i, 0)),
                scratch_shapes=[pltpu.VMEM((tile_m, E), jnp.float32)],
            ),
            compiler_params=pltpu.CompilerParams(
                dimension_semantics=("parallel", "arbitrary"),
                vmem_limit_bytes=vmem_limit,
            ),
        )(xc, w1c, b1c, w2c, b2c)

    return out2[:M].reshape(B, S, E)


def init_params(key, embed_size, dtype=jnp.float32):
    """Deterministic PyTorch-nn.Linear-style uniform init (weights stored (in, out))."""
    hidden = 4 * embed_size
    k1, k2, k3, k4 = jax.random.split(key, 4)
    bound1 = 1.0 / math.sqrt(embed_size)
    bound2 = 1.0 / math.sqrt(hidden)
    w1 = jax.random.uniform(k1, (embed_size, hidden), dtype, -bound1, bound1)
    b1 = jax.random.uniform(k2, (hidden,), dtype, -bound1, bound1)
    w2 = jax.random.uniform(k3, (hidden, embed_size), dtype, -bound2, bound2)
    b2 = jax.random.uniform(k4, (embed_size,), dtype, -bound2, bound2)
    return w1, b1, w2, b2


if __name__ == "__main__":
    batch, seq, embed = 2, 8, 32          # hidden = 4 * embed = 128
    key = jax.random.PRNGKey(0)
    kx, kp = jax.random.split(key)

    x = jax.random.normal(kx, (batch, seq, embed), jnp.float32)
    w1, b1, w2, b2 = init_params(kp, embed)

    out = feed_forward(x, w1, b1, w2, b2)
    out = jax.block_until_ready(out)
    assert out.shape == (batch, seq, embed)
    assert out.dtype == x.dtype

    # Matching-precision reference (bf16 inputs/weights, f32 accumulation).
    cd = jnp.bfloat16
    x2 = x.reshape(-1, embed).astype(cd)
    h_ref = jnp.maximum(
        jnp.dot(x2, w1.astype(cd), preferred_element_type=jnp.float32)
        + b1.astype(cd).astype(jnp.float32), 0.0)
    y_ref = (jnp.dot(h_ref.astype(cd), w2.astype(cd),
                     preferred_element_type=jnp.float32)
             + b2.astype(cd).astype(jnp.float32)).reshape(batch, seq, embed)
    assert jnp.allclose(out, y_ref, atol=2e-2, rtol=2e-2), "mismatch vs bf16 reference"

    # Full-f32 reference (bf16-level tolerance).
    ref = (jnp.maximum(x.reshape(-1, embed) @ w1 + b1, 0.0) @ w2 + b2
           ).reshape(batch, seq, embed)
    assert jnp.allclose(out, ref, atol=6e-2, rtol=6e-2), "mismatch vs f32 reference"

    print("KERNEL_OK")
</pallas_src>

<mosaic_0001>
module attributes {stable_mosaic.version = 11 : i64} {
  func.func @_ffn_resident_kernel(%arg0: i32, %arg1: memref<16x32xbf16, #tpu.memory_space<vmem>>, %arg2: memref<32x128xbf16, #tpu.memory_space<vmem>>, %arg3: memref<1x128xbf16, #tpu.memory_space<vmem>>, %arg4: memref<128x32xbf16, #tpu.memory_space<vmem>>, %arg5: memref<1x32xbf16, #tpu.memory_space<vmem>>, %arg6: memref<16x32xf32, #tpu.memory_space<vmem>>) attributes {dimension_semantics = [#tpu.dimension_semantics<parallel>], iteration_bounds = array<i64: 1>, scalar_prefetch = 0 : i64, scratch_operands = 0 : i64, tpu.core_type = #tpu.core_type<tc>, window_params = [{transform_indices = @transform_0, window_bounds = array<i64: 16, 32>}, {pipeline_mode = #tpu.pipeline_mode<synchronous>, transform_indices = @transform_1, window_bounds = array<i64: 32, 128>}, {pipeline_mode = #tpu.pipeline_mode<synchronous>, transform_indices = @transform_2, window_bounds = array<i64: 1, 128>}, {pipeline_mode = #tpu.pipeline_mode<synchronous>, transform_indices = @transform_3, window_bounds = array<i64: 128, 32>}, {pipeline_mode = #tpu.pipeline_mode<synchronous>, transform_indices = @transform_4, window_bounds = array<i64: 1, 32>}, {transform_indices = @transform_5, window_bounds = array<i64: 16, 32>}]} {
    %c0 = arith.constant 0 : index
    %c0_0 = arith.constant 0 : index
    %0 = vector.load %arg1[%c0, %c0_0] : memref<16x32xbf16, #tpu.memory_space<vmem>>, vector<16x32xbf16>
    %c0_1 = arith.constant 0 : index
    %c0_2 = arith.constant 0 : index
    %1 = vector.load %arg2[%c0_1, %c0_2] : memref<32x128xbf16, #tpu.memory_space<vmem>>, vector<32x128xbf16>
    %cst = arith.constant dense<0.000000e+00> : vector<16x128xf32>
    %2 = tpu.matmul %0, %1, %cst {dimension_numbers = #tpu.dot_dimension_numbers<[1], [0], [0], [1], [0, 0, 1, 1], [], []>} : vector<16x32xbf16>, vector<32x128xbf16>, vector<16x128xf32> -> vector<16x128xf32>
    %c0_3 = arith.constant 0 : index
    %c0_4 = arith.constant 0 : index
    %3 = vector.load %arg3[%c0_3, %c0_4] : memref<1x128xbf16, #tpu.memory_space<vmem>>, vector<1x128xbf16>
    %4 = arith.extf %3 : vector<1x128xbf16> to vector<1x128xf32>
    %5 = vector.broadcast %4 : vector<1x128xf32> to vector<16x128xf32>
    %6 = arith.addf %2, %5 : vector<16x128xf32>
    %cst_5 = arith.constant 0.000000e+00 : f32
    %7 = vector.broadcast %cst_5 : f32 to vector<16x128xf32>
    %8 = arith.maximumf %6, %7 : vector<16x128xf32>
    %9 = arith.truncf %8 : vector<16x128xf32> to vector<16x128xbf16>
    %c0_6 = arith.constant 0 : index
    %c0_7 = arith.constant 0 : index
    %10 = vector.load %arg4[%c0_6, %c0_7] : memref<128x32xbf16, #tpu.memory_space<vmem>>, vector<128x32xbf16>
    %cst_8 = arith.constant dense<0.000000e+00> : vector<16x32xf32>
    %11 = tpu.matmul %9, %10, %cst_8 {dimension_numbers = #tpu.dot_dimension_numbers<[1], [0], [0], [1], [0, 0, 1, 1], [], []>} : vector<16x128xbf16>, vector<128x32xbf16>, vector<16x32xf32> -> vector<16x32xf32>
    %c0_9 = arith.constant 0 : index
    %c0_10 = arith.constant 0 : index
    %12 = vector.load %arg5[%c0_9, %c0_10] : memref<1x32xbf16, #tpu.memory_space<vmem>>, vector<1x32xbf16>
    %13 = arith.extf %12 : vector<1x32xbf16> to vector<1x32xf32>
    %14 = vector.broadcast %13 : vector<1x32xf32> to vector<16x32xf32>
    %15 = arith.addf %11, %14 : vector<16x32xf32>
    %c0_11 = arith.constant 0 : index
    %c0_12 = arith.constant 0 : index
    %16 = vector.load %arg6[%c0_11, %c0_12] : memref<16x32xf32, #tpu.memory_space<vmem>>, vector<16x32xf32>
    tpu.vector_store %arg6[%c0_11, %c0_12], %15 {strides = array<i32>} : memref<16x32xf32, #tpu.memory_space<vmem>>, vector<16x32xf32>,
    return
  }
  func.func @transform_0(%arg0: i32) -> (i32, i32) {
    %c0_i32 = arith.constant 0 : i32
    %c0_i32_0 = arith.constant 0 : i32
    return %arg0, %c0_i32 : i32, i32
  }
  func.func @transform_1(%arg0: i32) -> (i32, i32) {
    %c0_i32 = arith.constant 0 : i32
    %c0_i32_0 = arith.constant 0 : i32
    %c0_i32_1 = arith.constant 0 : i32
    return %c0_i32, %c0_i32_0 : i32, i32
  }
  func.func @transform_2(%arg0: i32) -> (i32, i32) {
    %c0_i32 = arith.constant 0 : i32
    %c0_i32_0 = arith.constant 0 : i32
    %c0_i32_1 = arith.constant 0 : i32
    return %c0_i32, %c0_i32_0 : i32, i32
  }
  func.func @transform_3(%arg0: i32) -> (i32, i32) {
    %c0_i32 = arith.constant 0 : i32
    %c0_i32_0 = arith.constant 0 : i32
    %c0_i32_1 = arith.constant 0 : i32
    return %c0_i32, %c0_i32_0 : i32, i32
  }
  func.func @transform_4(%arg0: i32) -> (i32, i32) {
    %c0_i32 = arith.constant 0 : i32
    %c0_i32_0 = arith.constant 0 : i32
    %c0_i32_1 = arith.constant 0 : i32
    return %c0_i32, %c0_i32_0 : i32, i32
  }
  func.func @transform_5(%arg0: i32) -> (i32, i32) {
    %c0_i32 = arith.constant 0 : i32
    %c0_i32_0 = arith.constant 0 : i32
    return %arg0, %c0_i32 : i32, i32
  }
}

</mosaic_0001>

<bundles_post_ra>
// kernel: tpu_custom_call.1
= control target key start
LH: loop header
LB: loop body
LE: loop exit
PB: predicated region body
PF: predicated region fallthrough
CT: control target
= control target key end

     0   :  { %v320_v1 = vmov 0.0   ;;  %vm321_vm0 = vmmov 0   ;;  %vm51_vm1 = vcmask 261120   ;;  %s409_s0 = inlined_call_operand.vmem [shape: bf16[16,32], index: 0, kind: input, shape index: {}]   ;;  %s410_s1 = inlined_call_operand.vmem [shape: bf16[32,128], index: 1, kind: input, shape index: {}]   ;;  %s411_s2 = inlined_call_operand.vmem [shape: bf16[1,128], index: 2, kind: input, shape index: {}]   ;;  %s412_s3 = inlined_call_operand.vmem [shape: bf16[128,32], index: 3, kind: input, shape index: {}]   ;;  %s413_s4 = inlined_call_operand.vmem [shape: bf16[1,32], index: 4, kind: input, shape index: {}]   ;;  %s414_s5 = inlined_call_operand.hbm [shape: f32[16,32], index: 5, kind: output, shape index: {}]  }
   0x1   :  { %v285_v0 = vld [vmem:[%s410_s1] sm:$0xff]   ;;  %252 = vmatprep.subr.bf16.mxu0 %v320_v1  ;;  %260 = vmatprep.subr.bf16.mxu1 %v320_v1  ;;  %v286_v2 = vld [vmem:[%s410_s1 + $0x8] sm:$0xff]   ;;  %v290_v6 = vld [vmem:[%s412_s3 + $0x10] sm:$0xff]  }
   0x2   :  { %253 = vmatpush3.bf16.msra.mxu0 %v285_v0  ;;  %256 = vmatprep.mubr.msk.bf16.mxu0 %vm321_vm0, %v320_v1  ;;  %v288_v3 = vld [vmem:[%s412_s3] sm:$0xff]   ;;  %v289_v5 = vld [vmem:[%s412_s3 + $0x8] sm:$0xff]  }
   0x3   :  { %254 = vmatprep.subr.bf16.mxu0 %v320_v1  ;;  %276 = vmatprep.mubr.msk.bf16.mxu1 %vm321_vm0, %v320_v1  ;;  %v287_v4 = vld [vmem:[%s409_s0] sm:$0xff]  }
   0x4   :  { %261 = vmatpush3.bf16.msra.mxu1 %v288_v3 }
   0x5   :  { %262 = vmatprep.subr.bf16.mxu1 %v320_v1 }
   0x6   :  { %255 = vmatpush3.bf16.msra.mxu0 %v286_v2 }
   0x8   :  { %263 = vmatpush3.bf16.msra.mxu1 %v289_v5 }
   0x9   :  { %257 = vmatmul.mubr.msk.bf16.vlgmr.msra.gmra.mrb[0].mxu0 %vm51_vm1, %v287_v4  ;;  %264 = vmatprep.subr.bf16.mxu1 %v320_v1 }
   0xa   :  { %10 = vsyncpa [#allocation3], 0  ;;  %v291_v7 = vld [vmem:[%s412_s3 + $0x18] sm:$0xff]   ;;  %v292_v8 = vld [vmem:[%s412_s3 + $0x20] sm:$0xff]   ;;  %v30_v12 = vlaneseq }
   0xb   :  { %v293_v9 = vld [vmem:[%s412_s3 + $0x28] sm:$0xff]   ;;  %v294_v10 = vld [vmem:[%s412_s3 + $0x30] sm:$0xff]   ;;  %v295_v11 = vld [vmem:[%s412_s3 + $0x38] sm:$0xff]  }
   0xc   :  { %265 = vmatpush3.bf16.msra.mxu1 %v290_v6  ;;  %v31_v13 = vshrl.u32 %v30_v12, 7  ;;  %v28_v14 = vld [vmem:[%s411_s2] sm:$0x1]  ;;  %s322_s2 = smov [#allocation2]  }
   0xd   :  { %266 = vmatprep.subr.bf16.mxu1 %v320_v1  ;;  %v29_v15 = vunpack.c.l.bf16 %v28_v14  ;;  %v115_v27 = vld [vmem:[%s413_s4] sm:$0x1]  ;;  %s217_s16 = sshll.u32 %s322_s2, 4  ;;  %s218_s16 = int_to_ptr.vmem [resolvable:$true] %s217_s16 }
   0xe   :  { %v32_v16 = vsub.s32 0, %v31_v13  ;;  %v116_v28 = vunpack.c.l.bf16 %v115_v27  ;;  %s296_s17 = scalar_lea.vmem %s218_s16, 256  ;;  %p301_p1 = scmp.lt.s32.totalorder %s218_s16, %s218_s16 }
   0xf   :  { %p297_p0 = scmp.ne.s32.totalorder %s218_s16, %s296_s17  ;;  %p302_p2 = scmp.lt.s32.totalorder %s296_s17, %s296_s17 }
  0x10   :  { %267 = vmatpush3.bf16.msra.mxu1 %v291_v7  ;;  %v33_v17 = vrot.slane %v29_v15, %v32_v16  ;;  %v120_v29 = vrot.slane %v116_v28, %v32_v16 }
  0x11   :  { %268 = vmatprep.subr.bf16.mxu1 %v320_v1  ;;  %p303_p3 = por %p302_p2, %p301_p1 }
  0x13   :  { %p304_p4 = pnand %p303_p3, %p297_p0 }
  0x14   :  { %269 = vmatpush3.bf16.msra.mxu1 %v292_v8 }
  0x15   :  { %270 = vmatprep.subr.bf16.mxu1 %v320_v1 }
  0x18   :  { %271 = vmatpush3.bf16.msra.mxu1 %v293_v9 }
  0x19   :  { %272 = vmatprep.subr.bf16.mxu1 %v320_v1 }
  0x1c   :  { %273 = vmatpush3.bf16.msra.mxu1 %v294_v10 }
  0x1d   :  { %274 = vmatprep.subr.bf16.mxu1 %v320_v1 }
  0x20   :  { %275 = vmatpush3.bf16.msra.mxu1 %v295_v11 }
  0xdc   :  { %v89_v18 = vpop.f32.mrb[0].mxu0 }
  0xdd   :  { %v90_v19 = vadd.f32 %v89_v18, %v33_v17  ;;  %v258_v20 = vpop.f32.mrb[1].mxu0 }
  0xde   :  { %v92_v21 = vpop.f32.mrb[2].mxu0 }
  0xdf   :  { %v93_v22 = vadd.f32 %v92_v21, %v33_v17  ;;  %v259_v23 = vpop.f32.mrb[3].mxu0  ;;  %v96_v24 = vmax.f32 %v90_v19, 0.0 }
  0xe1   :  { %v97_v25 = vmax.f32 %v93_v22, 0.0 }
  0xe3   :  { %v98_v26 = vpack.c.bf16 %v97_v25, %v96_v24 }
  0xe5   :  { %277 = vmatmul.mubr.bf16.vlgmr.msra.gmra.mrb[0].mxu1 %v98_v26 }
 0x1b8   :  { %v203_v30 = vpop.f32.mrb[0].mxu1 }
 0x1b9   :  { %v204_v31 = vadd.f32 %v203_v30, %v120_v29  ;;  %v278_v32 = vpop.f32.mrb[1].mxu1 }
 0x1ba   :  { %v206_v33 = vpop.f32.mrb[2].mxu1 }
 0x1bb   :  { %210 = vst.msk [vmem:[#allocation2] sm:$0xff] %vm51_vm1, %v204_v31  ;;  %v207_v34 = vadd.f32 %v206_v33, %v120_v29  ;;  %v279_v35 = vpop.f32.mrb[3].mxu1 }
 0x1bd   :  { %211 = vst.msk [vmem:[#allocation2 + $0x8] sm:$0xff] %vm51_vm1, %v207_v34 }
 0x1be   :  { %307 = shalt.err (!%p304_p4)
}
 0x1bf   :  { %s308_s19 = scalar_lea.hbm %s414_s5, 256 }
 0x1c0   :  { %p309_p5 = scmp.ne.s32.totalorder %s414_s5, %s308_s19  ;;  %p312_p6 = scmp.lt.u32.totalorder %s308_s19, %s414_s5 }
 0x1c2   :  { %p314_p7 = pnand %p312_p6, %p309_p5 }
 0x1c4   :  { %317 = shalt.err (!%p314_p7)
}
 0x1c5   :  { %s323_s24 = smov 128   ;;  %s324_s25 = smov 8  }
 0x1c6   :  { %223 = dma.vmem_to_hbm [thread:$0]  %s218_s16, 256, %s414_s5, [#allocation3], %s323_s24, %s323_s24, %s324_s25  }
 0x1c7   :  { %318 = dma.done.wait [#allocation3], 256  }
 0x1c8   :  { %319 = vsyncadd [#allocation3], 4294967040 }
 0x1c9   :  { %227 = vsyncpa [#allocation3], 1 }

</bundles_post_ra>
